<compile_context>
chip_gen: v5e
topology: v5e:2x2
jax: 0.10.0
libtpu: 0.0.40
codegen_flags: <defaults>
</compile_context>

<pallas_src>
import functools

import jax
import jax.numpy as jnp
from jax import lax
from jax.experimental import pallas as pl
from jax.experimental.pallas import tpu as pltpu


def _agnn_fused_kernel(beta_ref, x_ref, mask_ref, w1_ref, b1_ref, w2_ref, b2_ref,
                       o_ref, *, num_prop_layers):
    """Fused Agnn forward. Everything is VMEM-resident; betas come from SMEM."""
    neg_big = jnp.float32(-1e30)

    # --- Linear(nfeat, 16) + ReLU  (MXU + VPU) ---
    h = jnp.dot(x_ref[...], w1_ref[...], preferred_element_type=jnp.float32)
    h = jnp.maximum(h + b1_ref[...], 0.0)

    mask = mask_ref[...]  # [N, N], 1.0 where edge (source j -> target i) or self loop.

    # --- 3 x AGNNConv, unrolled in-kernel (per feedback: no grid steps) ---
    for layer in range(num_prop_layers):
        beta = beta_ref[layer]  # scalar from SMEM

        # Row-wise L2 normalize (F.normalize, eps=1e-12).
        norm = jnp.sqrt(jnp.sum(h * h, axis=-1, keepdims=True))
        hn = h / jnp.maximum(norm, 1e-12)

        # Cosine-similarity scores: hn @ hn^T on the MXU ("NT" matmul, no explicit
        # transpose materialized).
        scores = lax.dot_general(
            hn, hn, (((1,), (1,)), ((), ())),
            preferred_element_type=jnp.float32)
        scores = beta * scores

        # Mask to the graph neighborhood (incl. self loops), row-wise softmax.
        scores = jnp.where(mask > 0.0, scores, neg_big)
        scores = scores - jnp.max(scores, axis=-1, keepdims=True)
        p = jnp.exp(scores)
        p = p / jnp.sum(p, axis=-1, keepdims=True)

        # Propagate: h <- P @ h  (MXU).
        h = jnp.dot(p, h, preferred_element_type=jnp.float32)

    # --- Linear(16, nclass) + softmax over classes ---
    logits = jnp.dot(h, w2_ref[...], preferred_element_type=jnp.float32) + b2_ref[...]
    logits = logits - jnp.max(logits, axis=-1, keepdims=True)
    e = jnp.exp(logits)
    o_ref[...] = e / jnp.sum(e, axis=-1, keepdims=True)


def agnn_forward(x, adj_mask, params, *, num_prop_layers=3):
    """x: [N, nfeat] f32, adj_mask: [N, N] f32 (1.0 on edges + self loops).
    Returns softmax class probabilities [N, nclass]."""
    n, _ = x.shape
    nclass = params["w2"].shape[1]

    kernel = functools.partial(_agnn_fused_kernel, num_prop_layers=num_prop_layers)

    return pl.pallas_call(
        kernel,
        out_shape=jax.ShapeDtypeStruct((n, nclass), jnp.float32),
        in_specs=[
            pl.BlockSpec(memory_space=pltpu.MemorySpace.SMEM),   # betas [3]
            pl.BlockSpec(memory_space=pltpu.MemorySpace.VMEM),   # x
            pl.BlockSpec(memory_space=pltpu.MemorySpace.VMEM),   # adj mask
            pl.BlockSpec(memory_space=pltpu.MemorySpace.VMEM),   # w1
            pl.BlockSpec(memory_space=pltpu.MemorySpace.VMEM),   # b1
            pl.BlockSpec(memory_space=pltpu.MemorySpace.VMEM),   # w2
            pl.BlockSpec(memory_space=pltpu.MemorySpace.VMEM),   # b2
        ],
        out_specs=pl.BlockSpec(memory_space=pltpu.MemorySpace.VMEM),
    )(params["betas"], x, adj_mask, params["w1"], params["b1"],
      params["w2"], params["b2"])


def build_adj_mask(edge_index, num_nodes):
    """Dense neighborhood mask: mask[target, source] = 1 for every edge, plus self loops
    (AGNNConv uses add_self_loops=True)."""
    src, dst = edge_index[0], edge_index[1]
    mask = jnp.zeros((num_nodes, num_nodes), jnp.float32)
    mask = mask.at[dst, src].set(1.0)
    diag = jnp.arange(num_nodes)
    mask = mask.at[diag, diag].set(1.0)
    return mask


def init_params(key, nfeat, nhid, nclass, num_prop_layers=3):
    k1, k2, k3, k4 = jax.random.split(key, 4)
    s1 = 1.0 / jnp.sqrt(jnp.float32(nfeat))
    s2 = 1.0 / jnp.sqrt(jnp.float32(nhid))
    return {
        "w1": s1 * jax.random.normal(k1, (nfeat, nhid), jnp.float32),
        "b1": s1 * jax.random.normal(k2, (1, nhid), jnp.float32),
        "w2": s2 * jax.random.normal(k3, (nhid, nclass), jnp.float32),
        "b2": s2 * jax.random.normal(k4, (1, nclass), jnp.float32),
        # AGNNConv beta parameters (reset_parameters fills with 1.0).
        "betas": jnp.ones((num_prop_layers,), jnp.float32),
    }


def _reference_forward(x, adj_mask, params, num_prop_layers=3):
    """Pure-JAX reference of the Agnn forward pass (for correctness check)."""
    h = jnp.maximum(x @ params["w1"] + params["b1"], 0.0)
    for layer in range(num_prop_layers):
        beta = params["betas"][layer]
        norm = jnp.sqrt(jnp.sum(h * h, axis=-1, keepdims=True))
        hn = h / jnp.maximum(norm, 1e-12)
        s = beta * (hn @ hn.T)
        s = jnp.where(adj_mask > 0.0, s, -1e30)
        p = jax.nn.softmax(s, axis=-1)
        h = p @ h
    logits = h @ params["w2"] + params["b2"]
    return jax.nn.softmax(logits, axis=-1)


if __name__ == "__main__":
    N, NFEAT, NHID, NCLASS = 16, 8, 16, 4

    key = jax.random.PRNGKey(0)
    kx, kp = jax.random.split(key)

    # Node features [N, nfeat].
    x = jax.random.normal(kx, (N, NFEAT), jnp.float32)

    # Undirected ring graph as edge_index [2, E] (E = 2N directed edges).
    src = jnp.arange(N, dtype=jnp.int32)
    dst = (src + 1) % N
    edge_index = jnp.stack(
        [jnp.concatenate([src, dst]), jnp.concatenate([dst, src])], axis=0
    )

    adj_mask = build_adj_mask(edge_index, N)
    params = init_params(kp, NFEAT, NHID, NCLASS)

    out = agnn_forward(x, adj_mask, params)
    out = jax.block_until_ready(out)
    assert out.shape == (N, NCLASS)

    # Sanity checks: matches pure-JAX reference, rows are valid probability vectors.
    ref = _reference_forward(x, adj_mask, params)
    assert jnp.allclose(out, ref, atol=1e-5, rtol=1e-5), (out, ref)
    assert jnp.allclose(out.sum(-1), 1.0, atol=1e-5)

    print("KERNEL_OK")
</pallas_src>

<mosaic_0001>
module attributes {stable_mosaic.version = 11 : i64} {
  func.func @_agnn_fused_kernel(%arg0: memref<3xf32, #tpu.memory_space<smem>>, %arg1: memref<16x8xf32, #tpu.memory_space<vmem>>, %arg2: memref<16x16xf32, #tpu.memory_space<vmem>>, %arg3: memref<8x16xf32, #tpu.memory_space<vmem>>, %arg4: memref<1x16xf32, #tpu.memory_space<vmem>>, %arg5: memref<16x4xf32, #tpu.memory_space<vmem>>, %arg6: memref<1x4xf32, #tpu.memory_space<vmem>>, %arg7: memref<16x4xf32, #tpu.memory_space<vmem>>) attributes {dimension_semantics = [], scalar_prefetch = 0 : i64, scratch_operands = 0 : i64, tpu.core_type = #tpu.core_type<tc>} {
    %c0 = arith.constant 0 : index
    %c0_0 = arith.constant 0 : index
    %0 = vector.load %arg1[%c0, %c0_0] : memref<16x8xf32, #tpu.memory_space<vmem>>, vector<16x8xf32>
    %c0_1 = arith.constant 0 : index
    %c0_2 = arith.constant 0 : index
    %1 = vector.load %arg3[%c0_1, %c0_2] : memref<8x16xf32, #tpu.memory_space<vmem>>, vector<8x16xf32>
    %cst = arith.constant dense<0.000000e+00> : vector<16x16xf32>
    %2 = tpu.matmul %0, %1, %cst {dimension_numbers = #tpu.dot_dimension_numbers<[1], [0], [0], [1], [0, 0, 1, 1], [], []>} : vector<16x8xf32>, vector<8x16xf32>, vector<16x16xf32> -> vector<16x16xf32>
    %c0_3 = arith.constant 0 : index
    %c0_4 = arith.constant 0 : index
    %3 = vector.load %arg4[%c0_3, %c0_4] : memref<1x16xf32, #tpu.memory_space<vmem>>, vector<1x16xf32>
    %4 = vector.broadcast %3 : vector<1x16xf32> to vector<16x16xf32>
    %5 = arith.addf %2, %4 : vector<16x16xf32>
    %cst_5 = arith.constant 0.000000e+00 : f32
    %6 = vector.broadcast %cst_5 : f32 to vector<16x16xf32>
    %7 = arith.maximumf %5, %6 : vector<16x16xf32>
    %c0_6 = arith.constant 0 : index
    %c0_7 = arith.constant 0 : index
    %8 = vector.load %arg2[%c0_6, %c0_7] : memref<16x16xf32, #tpu.memory_space<vmem>>, vector<16x16xf32>
    %c0_8 = arith.constant 0 : index
    %9 = memref.load %arg0[%c0_8] : memref<3xf32, #tpu.memory_space<smem>>
    %10 = arith.mulf %7, %7 : vector<16x16xf32>
    %cst_9 = arith.constant dense<0.000000e+00> : vector<16xf32>
    %11 = vector.multi_reduction <add>, %10, %cst_9 [1] : vector<16x16xf32> to vector<16xf32>
    %12 = vector.shape_cast %11 : vector<16xf32> to vector<16x1xf32>
    %13 = math.sqrt %12 : vector<16x1xf32>
    %cst_10 = arith.constant 9.99999996E-13 : f32
    %14 = vector.broadcast %cst_10 : f32 to vector<16x1xf32>
    %15 = arith.maximumf %13, %14 : vector<16x1xf32>
    %16 = vector.broadcast %15 : vector<16x1xf32> to vector<16x16xf32>
    %17 = arith.divf %7, %16 : vector<16x16xf32>
    %cst_11 = arith.constant dense<0.000000e+00> : vector<16x16xf32>
    %18 = tpu.matmul %17, %17, %cst_11 {dimension_numbers = #tpu.dot_dimension_numbers<[1], [1], [0], [0], [0, 0, 1, 0], [], []>} : vector<16x16xf32>, vector<16x16xf32>, vector<16x16xf32> -> vector<16x16xf32>
    %19 = vector.broadcast %9 : f32 to vector<16x16xf32>
    %20 = arith.mulf %19, %18 : vector<16x16xf32>
    %cst_12 = arith.constant 0.000000e+00 : f32
    %21 = vector.broadcast %cst_12 : f32 to vector<16x16xf32>
    %22 = arith.cmpf ogt, %8, %21 : vector<16x16xf32>
    %cst_13 = arith.constant -1.000000e+30 : f32
    %23 = vector.broadcast %cst_13 : f32 to vector<16x16xf32>
    %24 = arith.select %22, %20, %23 : vector<16x16xi1>, vector<16x16xf32>
    %cst_14 = arith.constant dense<0xFF800000> : vector<16xf32>
    %25 = vector.multi_reduction <maximumf>, %24, %cst_14 [1] : vector<16x16xf32> to vector<16xf32>
    %26 = vector.shape_cast %25 : vector<16xf32> to vector<16x1xf32>
    %27 = vector.broadcast %26 : vector<16x1xf32> to vector<16x16xf32>
    %28 = arith.subf %24, %27 : vector<16x16xf32>
    %29 = math.exp %28 : vector<16x16xf32>
    %cst_15 = arith.constant dense<0.000000e+00> : vector<16xf32>
    %30 = vector.multi_reduction <add>, %29, %cst_15 [1] : vector<16x16xf32> to vector<16xf32>
    %31 = vector.shape_cast %30 : vector<16xf32> to vector<16x1xf32>
    %32 = vector.broadcast %31 : vector<16x1xf32> to vector<16x16xf32>
    %33 = arith.divf %29, %32 : vector<16x16xf32>
    %cst_16 = arith.constant dense<0.000000e+00> : vector<16x16xf32>
    %34 = tpu.matmul %33, %7, %cst_16 {dimension_numbers = #tpu.dot_dimension_numbers<[1], [0], [0], [1], [0, 0, 1, 1], [], []>} : vector<16x16xf32>, vector<16x16xf32>, vector<16x16xf32> -> vector<16x16xf32>
    %c1 = arith.constant 1 : index
    %35 = memref.load %arg0[%c1] : memref<3xf32, #tpu.memory_space<smem>>
    %36 = arith.mulf %34, %34 : vector<16x16xf32>
    %cst_17 = arith.constant dense<0.000000e+00> : vector<16xf32>
    %37 = vector.multi_reduction <add>, %36, %cst_17 [1] : vector<16x16xf32> to vector<16xf32>
    %38 = vector.shape_cast %37 : vector<16xf32> to vector<16x1xf32>
    %39 = math.sqrt %38 : vector<16x1xf32>
    %cst_18 = arith.constant 9.99999996E-13 : f32
    %40 = vector.broadcast %cst_18 : f32 to vector<16x1xf32>
    %41 = arith.maximumf %39, %40 : vector<16x1xf32>
    %42 = vector.broadcast %41 : vector<16x1xf32> to vector<16x16xf32>
    %43 = arith.divf %34, %42 : vector<16x16xf32>
    %cst_19 = arith.constant dense<0.000000e+00> : vector<16x16xf32>
    %44 = tpu.matmul %43, %43, %cst_19 {dimension_numbers = #tpu.dot_dimension_numbers<[1], [1], [0], [0], [0, 0, 1, 0], [], []>} : vector<16x16xf32>, vector<16x16xf32>, vector<16x16xf32> -> vector<16x16xf32>
    %45 = vector.broadcast %35 : f32 to vector<16x16xf32>
    %46 = arith.mulf %45, %44 : vector<16x16xf32>
    %cst_20 = arith.constant 0.000000e+00 : f32
    %47 = vector.broadcast %cst_20 : f32 to vector<16x16xf32>
    %48 = arith.cmpf ogt, %8, %47 : vector<16x16xf32>
    %cst_21 = arith.constant -1.000000e+30 : f32
    %49 = vector.broadcast %cst_21 : f32 to vector<16x16xf32>
    %50 = arith.select %48, %46, %49 : vector<16x16xi1>, vector<16x16xf32>
    %cst_22 = arith.constant dense<0xFF800000> : vector<16xf32>
    %51 = vector.multi_reduction <maximumf>, %50, %cst_22 [1] : vector<16x16xf32> to vector<16xf32>
    %52 = vector.shape_cast %51 : vector<16xf32> to vector<16x1xf32>
    %53 = vector.broadcast %52 : vector<16x1xf32> to vector<16x16xf32>
    %54 = arith.subf %50, %53 : vector<16x16xf32>
    %55 = math.exp %54 : vector<16x16xf32>
    %cst_23 = arith.constant dense<0.000000e+00> : vector<16xf32>
    %56 = vector.multi_reduction <add>, %55, %cst_23 [1] : vector<16x16xf32> to vector<16xf32>
    %57 = vector.shape_cast %56 : vector<16xf32> to vector<16x1xf32>
    %58 = vector.broadcast %57 : vector<16x1xf32> to vector<16x16xf32>
    %59 = arith.divf %55, %58 : vector<16x16xf32>
    %cst_24 = arith.constant dense<0.000000e+00> : vector<16x16xf32>
    %60 = tpu.matmul %59, %34, %cst_24 {dimension_numbers = #tpu.dot_dimension_numbers<[1], [0], [0], [1], [0, 0, 1, 1], [], []>} : vector<16x16xf32>, vector<16x16xf32>, vector<16x16xf32> -> vector<16x16xf32>
    %c2 = arith.constant 2 : index
    %61 = memref.load %arg0[%c2] : memref<3xf32, #tpu.memory_space<smem>>
    %62 = arith.mulf %60, %60 : vector<16x16xf32>
    %cst_25 = arith.constant dense<0.000000e+00> : vector<16xf32>
    %63 = vector.multi_reduction <add>, %62, %cst_25 [1] : vector<16x16xf32> to vector<16xf32>
    %64 = vector.shape_cast %63 : vector<16xf32> to vector<16x1xf32>
    %65 = math.sqrt %64 : vector<16x1xf32>
    %cst_26 = arith.constant 9.99999996E-13 : f32
    %66 = vector.broadcast %cst_26 : f32 to vector<16x1xf32>
    %67 = arith.maximumf %65, %66 : vector<16x1xf32>
    %68 = vector.broadcast %67 : vector<16x1xf32> to vector<16x16xf32>
    %69 = arith.divf %60, %68 : vector<16x16xf32>
    %cst_27 = arith.constant dense<0.000000e+00> : vector<16x16xf32>
    %70 = tpu.matmul %69, %69, %cst_27 {dimension_numbers = #tpu.dot_dimension_numbers<[1], [1], [0], [0], [0, 0, 1, 0], [], []>} : vector<16x16xf32>, vector<16x16xf32>, vector<16x16xf32> -> vector<16x16xf32>
    %71 = vector.broadcast %61 : f32 to vector<16x16xf32>
    %72 = arith.mulf %71, %70 : vector<16x16xf32>
    %cst_28 = arith.constant 0.000000e+00 : f32
    %73 = vector.broadcast %cst_28 : f32 to vector<16x16xf32>
    %74 = arith.cmpf ogt, %8, %73 : vector<16x16xf32>
    %cst_29 = arith.constant -1.000000e+30 : f32
    %75 = vector.broadcast %cst_29 : f32 to vector<16x16xf32>
    %76 = arith.select %74, %72, %75 : vector<16x16xi1>, vector<16x16xf32>
    %cst_30 = arith.constant dense<0xFF800000> : vector<16xf32>
    %77 = vector.multi_reduction <maximumf>, %76, %cst_30 [1] : vector<16x16xf32> to vector<16xf32>
    %78 = vector.shape_cast %77 : vector<16xf32> to vector<16x1xf32>
    %79 = vector.broadcast %78 : vector<16x1xf32> to vector<16x16xf32>
    %80 = arith.subf %76, %79 : vector<16x16xf32>
    %81 = math.exp %80 : vector<16x16xf32>
    %cst_31 = arith.constant dense<0.000000e+00> : vector<16xf32>
    %82 = vector.multi_reduction <add>, %81, %cst_31 [1] : vector<16x16xf32> to vector<16xf32>
    %83 = vector.shape_cast %82 : vector<16xf32> to vector<16x1xf32>
    %84 = vector.broadcast %83 : vector<16x1xf32> to vector<16x16xf32>
    %85 = arith.divf %81, %84 : vector<16x16xf32>
    %cst_32 = arith.constant dense<0.000000e+00> : vector<16x16xf32>
    %86 = tpu.matmul %85, %60, %cst_32 {dimension_numbers = #tpu.dot_dimension_numbers<[1], [0], [0], [1], [0, 0, 1, 1], [], []>} : vector<16x16xf32>, vector<16x16xf32>, vector<16x16xf32> -> vector<16x16xf32>
    %c0_33 = arith.constant 0 : index
    %c0_34 = arith.constant 0 : index
    %87 = vector.load %arg5[%c0_33, %c0_34] : memref<16x4xf32, #tpu.memory_space<vmem>>, vector<16x4xf32>
    %cst_35 = arith.constant dense<0.000000e+00> : vector<16x4xf32>
    %88 = tpu.matmul %86, %87, %cst_35 {dimension_numbers = #tpu.dot_dimension_numbers<[1], [0], [0], [1], [0, 0, 1, 1], [], []>} : vector<16x16xf32>, vector<16x4xf32>, vector<16x4xf32> -> vector<16x4xf32>
    %c0_36 = arith.constant 0 : index
    %c0_37 = arith.constant 0 : index
    %89 = vector.load %arg6[%c0_36, %c0_37] : memref<1x4xf32, #tpu.memory_space<vmem>>, vector<1x4xf32>
    %90 = vector.broadcast %89 : vector<1x4xf32> to vector<16x4xf32>
    %91 = arith.addf %88, %90 : vector<16x4xf32>
    %cst_38 = arith.constant dense<0xFF800000> : vector<16xf32>
    %92 = vector.multi_reduction <maximumf>, %91, %cst_38 [1] : vector<16x4xf32> to vector<16xf32>
    %93 = vector.shape_cast %92 : vector<16xf32> to vector<16x1xf32>
    %94 = vector.broadcast %93 : vector<16x1xf32> to vector<16x4xf32>
    %95 = arith.subf %91, %94 : vector<16x4xf32>
    %96 = math.exp %95 : vector<16x4xf32>
    %cst_39 = arith.constant dense<0.000000e+00> : vector<16xf32>
    %97 = vector.multi_reduction <add>, %96, %cst_39 [1] : vector<16x4xf32> to vector<16xf32>
    %98 = vector.shape_cast %97 : vector<16xf32> to vector<16x1xf32>
    %99 = vector.broadcast %98 : vector<16x1xf32> to vector<16x4xf32>
    %100 = arith.divf %96, %99 : vector<16x4xf32>
    %c0_40 = arith.constant 0 : index
    %c0_41 = arith.constant 0 : index
    %101 = vector.load %arg7[%c0_40, %c0_41] : memref<16x4xf32, #tpu.memory_space<vmem>>, vector<16x4xf32>
    tpu.vector_store %arg7[%c0_40, %c0_41], %100 {strides = array<i32>} : memref<16x4xf32, #tpu.memory_space<vmem>>, vector<16x4xf32>,
    return
  }
}

</mosaic_0001>

<bundles_post_ra>
// kernel: tpu_custom_call.1
= control target key start
LH: loop header
LB: loop body
LE: loop exit
PB: predicated region body
PF: predicated region fallthrough
CT: control target
= control target key end

     0   :  { %12 = vsyncpa [#allocation3], 0  ;;  %s799_s27 = smov [#allocation2]   ;;  %s968_s0 = inlined_call_operand.vmem [shape: f32[3], index: 0, kind: input, shape index: {}]   ;;  %s969_s1 = inlined_call_operand.vmem [shape: f32[16,8], index: 1, kind: input, shape index: {}]   ;;  %s970_s2 = inlined_call_operand.vmem [shape: f32[16,16], index: 2, kind: input, shape index: {}]   ;;  %s971_s3 = inlined_call_operand.vmem [shape: f32[8,16], index: 3, kind: input, shape index: {}]   ;;  %s972_s4 = inlined_call_operand.vmem [shape: f32[1,16], index: 4, kind: input, shape index: {}]   ;;  %s973_s5 = inlined_call_operand.vmem [shape: f32[16,4], index: 5, kind: input, shape index: {}]   ;;  %s974_s6 = inlined_call_operand.vmem [shape: f32[1,4], index: 6, kind: input, shape index: {}]   ;;  %s975_s7 = inlined_call_operand.vmem [shape: f32[16,4], index: 7, kind: output, shape index: {}]  }
   0x1   :  { %s18_s26 = sshll.u32 %s968_s0, 4  ;;  %s19_s26 = int_to_ptr.vmem [resolvable:$true] %s18_s26 }
   0x2   :  { %21 = dma.vmem_to_smem %s19_s26, 16, %s799_s27, [#allocation3]  }
   0x3   :  { %797 = dma.done.wait [#allocation3], 16  }
   0x4   :  { %798 = vsyncadd [#allocation3], 4294967280 }
   0x5   :  { %38 = sfence }
   0x6   :  { %v41_v0 = vld [vmem:[%s971_s3] sm:$0xff]  ;;  %vm46_vm0 = vcmask 64512   ;;  %v40_v2 = vld [vmem:[%s969_s1 + $0x8] sm:$0xff]  ;;  %vm83_vm1 = vcmask 130048   ;;  %s717_s14 = sld [smem:[#allocation2 + $0x2]] }
   0x7   :  { %v39_v1 = vld [vmem:[%s969_s1] sm:$0xff]  ;;  %68 = vmatpush.msra.mxu0 %v41_v0  ;;  %s80_s1 = sld [smem:[#allocation2]] }
   0x8   :  { %702 = vmatmul.msk.f32.vlgmr.msra.gmra.mxu0 %vm46_vm0, %v39_v1  ;;  %v727_v4 = vld [vmem:[%s972_s4] ss:$0 sm:$0xff] }
   0x9   :  { %v870_v60 = vld [vmem:[%s970_s2] sm:$0xff] }
   0xa   :  { %vm178_vm14 = vcmp.gt.f32.partialorder %v870_v60, 0.0 }
   0xd   :  { %v175_v61 = vstv %s80_s1 }
  0x10   :  { %703 = vmatmul.msk.f32.gmra.mxu0 %vm46_vm0, %v40_v2  ;;  %v879_v2 = vld [vmem:[%s970_s2 + $0x8] sm:$0xff]  ;;  %s710_s2 = sld [smem:[#allocation2 + $0x1]] }
  0x11   :  { %vm179_vm15 = vcmp.gt.f32.partialorder %v879_v2, 0.0  ;;  %v612_v2 = vld [vmem:[%s973_s5 + $0x8] sm:$0xff] }
  0x85   :  { %v70_v3 = vpop.f32.mrf.mxu0 }
  0x86   :  { %v71_v6 = vadd.f32 %v727_v4, %v70_v3 }
  0x88   :  { %v855_v9 = vmax.f32 %v71_v6, 0.0 }
  0x8a   :  { %v81_v12 = vmul.f32 %v855_v9, %v855_v9 }
  0x8c   :  { %v84_v13 = vsel %vm83_vm1, %v81_v12, 0.0 }
  0x8d   :  { %v73_v5 = vpop.f32.mrf.mxu0 }
  0x8e   :  { %v74_v7 = vadd.f32 %v727_v4, %v73_v5 }
  0x90   :  { %v77_v8 = vmax.f32 %v74_v7, 0.0 }
  0x92   :  { %250 = vmatpush.msra.mxu2 %v77_v8  ;;  %v82_v10 = vmul.f32 %v77_v8, %v77_v8 }
  0x94   :  { %251 = vmatpush.msra.mxu2 %v855_v9  ;;  %v87_v11 = vsel %vm83_vm1, %v82_v10, 0.0 }
  0x95   :  { %88 = vadd.xlane.f32.xlu0 %v87_v11 }
  0x9d   :  { %85 = vadd.xlane.f32.xlu0 %v84_v13 }
 0x108   :  { %v89_v14 = vpop.xlane.xlu0 %88 }
 0x109   :  { %729 = vrsqrt.f32 %v89_v14  ;;  %vm109_vm2 = vcmp.eq.f32.partialorder %v89_v14, inf  ;;  %v112_v26 = vand.u32 2147483648, %v89_v14  ;;  %vm111_vm3 = vcmp.eq.f32.partialorder %v89_v14, 0.0 }
 0x10f   :  { %v730_v15 = vpop.eup %729 }
 0x110   :  { %v103_v16 = vmul.f32 %v730_v15, %v89_v14  ;;  %v86_v17 = vpop.xlane.xlu0 %85 }
 0x111   :  { %731 = vrsqrt.f32 %v86_v17  ;;  %vm97_vm4 = vcmp.eq.f32.partialorder %v86_v17, inf  ;;  %v100_v34 = vand.u32 2147483648, %v86_v17  ;;  %vm99_vm5 = vcmp.eq.f32.partialorder %v86_v17, 0.0 }
 0x112   :  { %v104_v18 = vmul.f32 %v730_v15, %v103_v16 }
 0x114   :  { %v105_v19 = vmul.f32 0.5, %v104_v18 }
 0x116   :  { %v106_v20 = vsub.f32 1.5, %v105_v19 }
 0x117   :  { %v732_v21 = vpop.eup %731 }
 0x118   :  { %v107_v22 = vmul.f32 %v730_v15, %v106_v20  ;;  %v91_v23 = vmul.f32 %v732_v21, %v86_v17 }
 0x11a   :  { %v108_v24 = vmul.f32 %v107_v22, %v89_v14  ;;  %v92_v25 = vmul.f32 %v732_v21, %v91_v23 }
 0x11c   :  { %v110_v27 = vsel %vm109_vm2, %v89_v14, %v108_v24  ;;  %v93_v28 = vmul.f32 0.5, %v92_v25 }
 0x11d   :  { %v113_v29 = vsel %vm111_vm3, %v112_v26, %v110_v27 }
 0x11e   :  { %v94_v30 = vsub.f32 1.5, %v93_v28  ;;  %v115_v31 = vmax.f32 %v113_v29, 1e-12 }
 0x120   :  { %v95_v32 = vmul.f32 %v732_v21, %v94_v30  ;;  %733 = vrcp.f32 %v115_v31  ;;  %v142_v41 = vand.u32 2147483648, %v115_v31  ;;  %v140_v43 = vand.u32 2147483647, %v115_v31 }
 0x121   :  { %vm136_vm7 = vweird.f32 %v115_v31 }
 0x122   :  { %v96_v33 = vmul.f32 %v95_v32, %v86_v17  ;;  %v143_v46 = vor.u32 1.1754944e-38, %v142_v41  ;;  %vm141_vm9 = vcmp.eq.f32.partialorder %v140_v43, 8.507059e+37 }
 0x124   :  { %v98_v35 = vsel %vm97_vm4, %v86_v17, %v96_v33 }
 0x125   :  { %v101_v36 = vsel %vm99_vm5, %v100_v34, %v98_v35 }
 0x126   :  { %v734_v37 = vpop.eup %733  ;;  %v114_v38 = vmax.f32 %v101_v36, 1e-12 }
 0x127   :  { %v132_v39 = vmul.f32 %v734_v37, %v115_v31  ;;  %vm137_vm6 = vweird.f32 %v734_v37 }
 0x128   :  { %735 = vrcp.f32 %v114_v38  ;;  %vm138_vm8 = vmor %vm136_vm7, %vm137_vm6  ;;  %v127_v52 = vand.u32 2147483648, %v114_v38  ;;  %v125_v54 = vand.u32 2147483647, %v114_v38  ;;  %vm121_vm11 = vweird.f32 %v114_v38 }
 0x129   :  { %v133_v40 = vsub.f32 1.0, %v132_v39 }
 0x12a   :  { %v128_v56 = vor.u32 1.1754944e-38, %v127_v52  ;;  %vm126_vm13 = vcmp.eq.f32.partialorder %v125_v54, 8.507059e+37 }
 0x12b   :  { %v134_v42 = vmul.f32 %v734_v37, %v133_v40 }
 0x12d   :  { %v135_v44 = vadd.f32 %v734_v37, %v134_v42 }
 0x12e   :  { %v736_v45 = vpop.eup %735 }
 0x12f   :  { %v139_v47 = vsel %vm138_vm8, %v734_v37, %v135_v44  ;;  %v117_v48 = vmul.f32 %v736_v45, %v114_v38  ;;  %vm122_vm10 = vweird.f32 %v736_v45 }
 0x130   :  { %v144_v49 = vsel %vm141_vm9, %v143_v46, %v139_v47  ;;  %vm123_vm12 = vmor %vm121_vm11, %vm122_vm10 }
 0x131   :  { %v145_v50 = vmul.f32 %v144_v49, %v77_v8  ;;  %v118_v51 = vsub.f32 1.0, %v117_v48 }
 0x133   :  { %704 = vmatpush.xpose.msk.msra.mxu1 %vm83_vm1, %v145_v50  ;;  %v119_v53 = vmul.f32 %v736_v45, %v118_v51 }
 0x135   :  { %v120_v55 = vadd.f32 %v736_v45, %v119_v53 }
 0x137   :  { %v124_v57 = vsel %vm123_vm12, %v736_v45, %v120_v55 }
 0x138   :  { %v129_v58 = vsel %vm126_vm13, %v128_v56, %v124_v57 }
 0x139   :  { %v130_v59 = vmul.f32 %v129_v58, %v855_v9 }
 0x13b   :  { %705 = vmatpush.xpose.msk.msra.mxu1 %vm83_vm1, %v130_v59 }
 0x13e   :  { %706 = vmatmul.msk.f32.vlgmr.msra.gmra.mxu1 %vm83_vm1, %v130_v59 }
 0x146   :  { %707 = vmatmul.msk.f32.gmra.mxu1 %vm83_vm1, %v145_v50 }
 0x1bb   :  { %v169_v62 = vpop.f32.mrf.mxu1 }
 0x1bc   :  { %v176_v63 = vmul.f32 %v175_v61, %v169_v62 }
 0x1be   :  { %v180_v0 = vsel %vm178_vm14, %v176_v63, -1e+30 }
 0x1bf   :  { %v182_v1 = vsel %vm83_vm1, %v180_v0, -inf }
 0x1c0   :  { %183 = vmax.xlane.f32.xlu1 %v182_v1 }
 0x1c3   :  { %v172_v3 = vpop.f32.mrf.mxu1 }
 0x1c4   :  { %v177_v4 = vmul.f32 %v175_v61, %v172_v3 }
 0x1c6   :  { %v181_v5 = vsel %vm179_vm15, %v177_v4, -1e+30 }
 0x1c7   :  { %v185_v6 = vsel %vm83_vm1, %v181_v5, -inf }
 0x1c8   :  { %186 = vmax.xlane.f32.xlu1 %v185_v6 }
 0x233   :  { %v184_v7 = vpop.xlane.xlu1 %183 }
 0x234   :  { %v188_v8 = vsub.f32 %v180_v0, %v184_v7 }
 0x236   :  { %v190_v9 = vmul.f32 1.442695, %v188_v8 }
 0x238   :  { %737 = vpow2.f32 %v190_v9 }
 0x23b   :  { %v187_v10 = vpop.xlane.xlu1 %186 }
 0x23c   :  { %v189_v11 = vsub.f32 %v181_v5, %v187_v10 }
 0x23e   :  { %v738_v12 = vpop.eup %737  ;;  %v192_v13 = vmul.f32 1.442695, %v189_v11 }
 0x23f   :  { %v194_v14 = vsel %vm83_vm1, %v738_v12, 0.0 }
 0x240   :  { %739 = vpow2.f32 %v192_v13  ;;  %195 = vadd.xlane.f32.xlu2 %v194_v14 }
 0x246   :  { %v740_v15 = vpop.eup %739 }
 0x247   :  { %v197_v16 = vsel %vm83_vm1, %v740_v15, 0.0 }
 0x248   :  { %198 = vadd.xlane.f32.xlu2 %v197_v16 }
 0x2b3   :  { %v196_v17 = vpop.xlane.xlu2 %195 }
 0x2b4   :  { %741 = vrcp.f32 %v196_v17  ;;  %v211_v22 = vand.u32 2147483648, %v196_v17  ;;  %v209_v24 = vand.u32 2147483647, %v196_v17  ;;  %vm205_vm2 = vweird.f32 %v196_v17 }
 0x2b6   :  { %v212_v27 = vor.u32 1.1754944e-38, %v211_v22  ;;  %vm210_vm4 = vcmp.eq.f32.partialorder %v209_v24, 8.507059e+37 }
 0x2ba   :  { %v742_v18 = vpop.eup %741 }
 0x2bb   :  { %v201_v19 = vmul.f32 %v742_v18, %v196_v17  ;;  %v199_v20 = vpop.xlane.xlu2 %198  ;;  %vm206_vm0 = vweird.f32 %v742_v18 }
 0x2bc   :  { %743 = vrcp.f32 %v199_v20  ;;  %vm207_vm3 = vmor %vm205_vm2, %vm206_vm0  ;;  %v226_v33 = vand.u32 2147483648, %v199_v20  ;;  %v224_v35 = vand.u32 2147483647, %v199_v20  ;;  %vm220_vm6 = vweird.f32 %v199_v20 }
 0x2bd   :  { %v202_v21 = vsub.f32 1.0, %v201_v19 }
 0x2be   :  { %v227_v37 = vor.u32 1.1754944e-38, %v226_v33  ;;  %vm225_vm8 = vcmp.eq.f32.partialorder %v224_v35, 8.507059e+37 }
 0x2bf   :  { %v203_v23 = vmul.f32 %v742_v18, %v202_v21 }
 0x2c1   :  { %v204_v25 = vadd.f32 %v742_v18, %v203_v23 }
 0x2c2   :  { %v744_v26 = vpop.eup %743 }
 0x2c3   :  { %v216_v28 = vmul.f32 %v744_v26, %v199_v20  ;;  %v208_v29 = vsel %vm207_vm3, %v742_v18, %v204_v25  ;;  %vm221_vm5 = vweird.f32 %v744_v26 }
 0x2c4   :  { %v213_v30 = vsel %vm210_vm4, %v212_v27, %v208_v29  ;;  %vm222_vm7 = vmor %vm220_vm6, %vm221_vm5 }
 0x2c5   :  { %v217_v31 = vsub.f32 1.0, %v216_v28  ;;  %v214_v32 = vmul.f32 %v738_v12, %v213_v30 }
 0x2c7   :  { %v218_v34 = vmul.f32 %v744_v26, %v217_v31  ;;  %708 = vmatmul.msk.f32.vlgmr.msra.gmra.mxu2 %vm83_vm1, %v214_v32  ;;  %v353_v31 = vstv %s710_s2 }
 0x2c9   :  { %v219_v36 = vadd.f32 %v744_v26, %v218_v34 }
 0x2cb   :  { %v223_v38 = vsel %vm222_vm7, %v744_v26, %v219_v36 }
 0x2cc   :  { %v228_v39 = vsel %vm225_vm8, %v227_v37, %v223_v38 }
 0x2cd   :  { %v229_v40 = vmul.f32 %v740_v15, %v228_v39 }
 0x2cf   :  { %709 = vmatmul.msk.f32.gmra.mxu2 %vm83_vm1, %v229_v40 }
 0x34a   :  { %v889_v41 = vpop.f32.mrf.mxu2 }
 0x34b   :  { %v260_v42 = vmul.f32 %v889_v41, %v889_v41 }
 0x34d   :  { %v262_v43 = vsel %vm83_vm1, %v260_v42, 0.0 }
 0x34e   :  { %263 = vadd.xlane.f32.xlu1 %v262_v43 }
 0x352   :  { %v894_v44 = vpop.f32.mrf.mxu2 }
 0x353   :  { %426 = vmatpush.msrb.mxu0 %v894_v44  ;;  %v261_v45 = vmul.f32 %v894_v44, %v894_v44 }
 0x355   :  { %427 = vmatpush.msrb.mxu0 %v889_v41  ;;  %v265_v46 = vsel %vm83_vm1, %v261_v45, 0.0 }
 0x356   :  { %266 = vadd.xlane.f32.xlu0 %v265_v46 }
 0x3c1   :  { %v264_v47 = vpop.xlane.xlu1 %263 }
 0x3c2   :  { %745 = vrsqrt.f32 %v264_v47  ;;  %vm275_vm9 = vcmp.eq.f32.partialorder %v264_v47, inf  ;;  %v278_v59 = vand.u32 2147483648, %v264_v47  ;;  %vm277_vm10 = vcmp.eq.f32.partialorder %v264_v47, 0.0 }
 0x3c8   :  { %v746_v48 = vpop.eup %745 }
 0x3c9   :  { %v269_v49 = vmul.f32 %v746_v48, %v264_v47  ;;  %v267_v50 = vpop.xlane.xlu0 %266 }
 0x3ca   :  { %747 = vrsqrt.f32 %v267_v50  ;;  %vm287_vm11 = vcmp.eq.f32.partialorder %v267_v50, inf  ;;  %v290_v5 = vand.u32 2147483648, %v267_v50  ;;  %vm289_vm12 = vcmp.eq.f32.partialorder %v267_v50, 0.0 }
 0x3cb   :  { %v270_v51 = vmul.f32 %v746_v48, %v269_v49 }
 0x3cd   :  { %v271_v52 = vmul.f32 0.5, %v270_v51 }
 0x3cf   :  { %v272_v53 = vsub.f32 1.5, %v271_v52 }
 0x3d0   :  { %v748_v54 = vpop.eup %747 }
 0x3d1   :  { %v273_v55 = vmul.f32 %v746_v48, %v272_v53  ;;  %v281_v56 = vmul.f32 %v748_v54, %v267_v50 }
 0x3d3   :  { %v274_v57 = vmul.f32 %v273_v55, %v264_v47  ;;  %v282_v58 = vmul.f32 %v748_v54, %v281_v56 }
 0x3d5   :  { %v276_v61 = vsel %vm275_vm9, %v264_v47, %v274_v57  ;;  %v283_v62 = vmul.f32 0.5, %v282_v58 }
 0x3d6   :  { %v279_v63 = vsel %vm277_vm10, %v278_v59, %v276_v61 }
 0x3d7   :  { %v292_v0 = vmax.f32 %v279_v63, 1e-12  ;;  %v284_v1 = vsub.f32 1.5, %v283_v62 }
 0x3d9   :  { %749 = vrcp.f32 %v292_v0  ;;  %v285_v3 = vmul.f32 %v748_v54, %v284_v1  ;;  %vm299_vm2 = vweird.f32 %v292_v0  ;;  %v305_v20 = vand.u32 2147483648, %v292_v0 }
 0x3da   :  { %v303_v22 = vand.u32 2147483647, %v292_v0 }
 0x3db   :  { %v286_v4 = vmul.f32 %v285_v3, %v267_v50  ;;  %v306_v27 = vor.u32 1.1754944e-38, %v305_v20 }
 0x3dc   :  { %vm304_vm7 = vcmp.eq.f32.partialorder %v303_v22, 8.507059e+37 }
 0x3dd   :  { %v288_v6 = vsel %vm287_vm11, %v267_v50, %v286_v4 }
 0x3de   :  { %v291_v7 = vsel %vm289_vm12, %v290_v5, %v288_v6 }
 0x3df   :  { %v750_v8 = vpop.eup %749  ;;  %v293_v9 = vmax.f32 %v291_v7, 1e-12 }
 0x3e0   :  { %v295_v10 = vmul.f32 %v750_v8, %v292_v0  ;;  %vm300_vm13 = vweird.f32 %v750_v8 }
 0x3e1   :  { %751 = vrcp.f32 %v293_v9  ;;  %v320_v16 = vand.u32 2147483648, %v293_v9  ;;  %v318_v18 = vand.u32 2147483647, %v293_v9  ;;  %vm314_vm3 = vweird.f32 %v293_v9  ;;  %vm301_vm4 = vmor %vm299_vm2, %vm300_vm13 }
 0x3e2   :  { %v296_v11 = vsub.f32 1.0, %v295_v10 }
 0x3e3   :  { %v321_v23 = vor.u32 1.1754944e-38, %v320_v16  ;;  %vm319_vm6 = vcmp.eq.f32.partialorder %v318_v18, 8.507059e+37 }
 0x3e4   :  { %v297_v14 = vmul.f32 %v750_v8, %v296_v11 }
 0x3e6   :  { %v298_v19 = vadd.f32 %v750_v8, %v297_v14 }
 0x3e7   :  { %v752_v12 = vpop.eup %751 }
 0x3e8   :  { %v310_v13 = vmul.f32 %v752_v12, %v293_v9  ;;  %vm315_vm0 = vweird.f32 %v752_v12  ;;  %v302_v25 = vsel %vm301_vm4, %v750_v8, %v298_v19 }
 0x3e9   :  { %vm316_vm5 = vmor %vm314_vm3, %vm315_vm0  ;;  %v307_v29 = vsel %vm304_vm7, %v306_v27, %v302_v25 }
 0x3ea   :  { %v311_v15 = vsub.f32 1.0, %v310_v13  ;;  %v308_v30 = vmul.f32 %v307_v29, %v889_v41 }
 0x3ec   :  { %v312_v17 = vmul.f32 %v752_v12, %v311_v15 }
 0x3ee   :  { %v313_v21 = vadd.f32 %v752_v12, %v312_v17 }
 0x3f0   :  { %v317_v24 = vsel %vm316_vm5, %v752_v12, %v313_v21 }
 0x3f1   :  { %v322_v26 = vsel %vm319_vm6, %v321_v23, %v317_v24 }
 0x3f2   :  { %v323_v28 = vmul.f32 %v322_v26, %v894_v44 }
 0x3f4   :  { %711 = vmatpush.xpose.msk.msra.mxu3 %vm83_vm1, %v323_v28 }
 0x3f8   :  { %712 = vmatpush.xpose.msk.msra.mxu3 %vm83_vm1, %v308_v30 }
 0x3fb   :  { %713 = vmatmul.msk.f32.vlgmr.msra.gmra.mxu3 %vm83_vm1, %v308_v30 }
 0x3fc   :  { %637 = vmatpush.msrb.mxu3 %v612_v2 }
 0x403   :  { %714 = vmatmul.msk.f32.gmra.mxu3 %vm83_vm1, %v323_v28 }
 0x47e   :  { %v347_v32 = vpop.f32.mrf.mxu3 }
 0x47f   :  { %v354_v33 = vmul.f32 %v353_v31, %v347_v32 }
 0x481   :  { %v356_v34 = vsel %vm178_vm14, %v354_v33, -1e+30 }
 0x482   :  { %v358_v35 = vsel %vm83_vm1, %v356_v34, -inf }
 0x483   :  { %359 = vmax.xlane.f32.xlu2 %v358_v35 }
 0x486   :  { %v350_v36 = vpop.f32.mrf.mxu3 }
 0x487   :  { %v355_v37 = vmul.f32 %v353_v31, %v350_v36 }
 0x489   :  { %v357_v38 = vsel %vm179_vm15, %v355_v37, -1e+30 }
 0x48a   :  { %v361_v39 = vsel %vm83_vm1, %v357_v38, -inf }
 0x48b   :  { %362 = vmax.xlane.f32.xlu0 %v361_v39 }
 0x4f6   :  { %v360_v40 = vpop.xlane.xlu2 %359 }
 0x4f7   :  { %v364_v41 = vsub.f32 %v356_v34, %v360_v40 }
 0x4f9   :  { %v366_v42 = vmul.f32 1.442695, %v364_v41 }
 0x4fb   :  { %753 = vpow2.f32 %v366_v42 }
 0x4fe   :  { %v363_v43 = vpop.xlane.xlu0 %362 }
 0x4ff   :  { %v365_v44 = vsub.f32 %v357_v38, %v363_v43 }
 0x501   :  { %v754_v45 = vpop.eup %753  ;;  %v368_v46 = vmul.f32 1.442695, %v365_v44 }
 0x502   :  { %v370_v47 = vsel %vm83_vm1, %v754_v45, 0.0 }
 0x503   :  { %755 = vpow2.f32 %v368_v46  ;;  %371 = vadd.xlane.f32.xlu1 %v370_v47 }
 0x509   :  { %v756_v48 = vpop.eup %755 }
 0x50a   :  { %v373_v49 = vsel %vm83_vm1, %v756_v48, 0.0 }
 0x50b   :  { %374 = vadd.xlane.f32.xlu2 %v373_v49 }
 0x576   :  { %v372_v50 = vpop.xlane.xlu1 %371 }
 0x577   :  { %757 = vrcp.f32 %v372_v50  ;;  %v387_v55 = vand.u32 2147483648, %v372_v50  ;;  %v385_v57 = vand.u32 2147483647, %v372_v50  ;;  %vm381_vm9 = vweird.f32 %v372_v50 }
 0x579   :  { %v388_v61 = vor.u32 1.1754944e-38, %v387_v55  ;;  %vm386_vm11 = vcmp.eq.f32.partialorder %v385_v57, 8.507059e+37 }
 0x57d   :  { %v758_v51 = vpop.eup %757 }
 0x57e   :  { %v377_v52 = vmul.f32 %v758_v51, %v372_v50  ;;  %v375_v53 = vpop.xlane.xlu2 %374  ;;  %vm382_vm8 = vweird.f32 %v758_v51 }
 0x57f   :  { %759 = vrcp.f32 %v375_v53  ;;  %vm383_vm10 = vmor %vm381_vm9, %vm382_vm8  ;;  %v402_v4 = vand.u32 2147483648, %v375_v53  ;;  %v400_v6 = vand.u32 2147483647, %v375_v53  ;;  %vm396_vm13 = vweird.f32 %v375_v53 }
 0x580   :  { %v378_v54 = vsub.f32 1.0, %v377_v52 }
 0x581   :  { %v403_v8 = vor.u32 1.1754944e-38, %v402_v4  ;;  %vm401_vm2 = vcmp.eq.f32.partialorder %v400_v6, 8.507059e+37 }
 0x582   :  { %v379_v56 = vmul.f32 %v758_v51, %v378_v54 }
 0x584   :  { %v380_v58 = vadd.f32 %v758_v51, %v379_v56 }
 0x585   :  { %v760_v59 = vpop.eup %759 }
 0x586   :  { %v392_v62 = vmul.f32 %v760_v59, %v375_v53  ;;  %v384_v63 = vsel %vm383_vm10, %v758_v51, %v380_v58  ;;  %vm397_vm12 = vweird.f32 %v760_v59 }
 0x587   :  { %v389_v0 = vsel %vm386_vm11, %v388_v61, %v384_v63  ;;  %vm398_vm0 = vmor %vm396_vm13, %vm397_vm12 }
 0x588   :  { %v393_v1 = vsub.f32 1.0, %v392_v62  ;;  %v390_v3 = vmul.f32 %v754_v45, %v389_v0 }
 0x58a   :  { %v394_v5 = vmul.f32 %v760_v59, %v393_v1  ;;  %715 = vmatmul.msk.f32.vlgmr.msrb.gmra.mxu0 %vm83_vm1, %v390_v3  ;;  %v529_v1 = vstv %s717_s14 }
 0x58c   :  { %v395_v7 = vadd.f32 %v760_v59, %v394_v5 }
 0x58e   :  { %v399_v9 = vsel %vm398_vm0, %v760_v59, %v395_v7 }
 0x58f   :  { %v404_v10 = vsel %vm401_vm2, %v403_v8, %v399_v9 }
 0x590   :  { %v405_v11 = vmul.f32 %v756_v48, %v404_v10 }
 0x592   :  { %716 = vmatmul.msk.f32.gmra.mxu0 %vm83_vm1, %v405_v11 }
 0x607   :  { %v917_v12 = vpop.f32.mrf.mxu0 }
 0x608   :  { %v436_v13 = vmul.f32 %v917_v12, %v917_v12 }
 0x60a   :  { %v438_v14 = vsel %vm83_vm1, %v436_v13, 0.0 }
 0x60b   :  { %439 = vadd.xlane.f32.xlu1 %v438_v14 }
 0x60f   :  { %v922_v15 = vpop.f32.mrf.mxu0 }
 0x610   :  { %v437_v16 = vmul.f32 %v922_v15, %v922_v15  ;;  %602 = vmatpush.msrb.mxu1 %v922_v15 }
 0x612   :  { %603 = vmatpush.msrb.mxu1 %v917_v12  ;;  %v441_v17 = vsel %vm83_vm1, %v437_v16, 0.0 }
 0x613   :  { %442 = vadd.xlane.f32.xlu0 %v441_v17 }
 0x67e   :  { %v440_v18 = vpop.xlane.xlu1 %439 }
 0x67f   :  { %761 = vrsqrt.f32 %v440_v18  ;;  %vm451_vm3 = vcmp.eq.f32.partialorder %v440_v18, inf  ;;  %v454_v30 = vand.u32 2147483648, %v440_v18  ;;  %vm453_vm4 = vcmp.eq.f32.partialorder %v440_v18, 0.0 }
 0x685   :  { %v762_v19 = vpop.eup %761 }
 0x686   :  { %v445_v20 = vmul.f32 %v762_v19, %v440_v18  ;;  %v443_v21 = vpop.xlane.xlu0 %442 }
 0x687   :  { %763 = vrsqrt.f32 %v443_v21  ;;  %vm463_vm5 = vcmp.eq.f32.partialorder %v443_v21, inf  ;;  %v466_v38 = vand.u32 2147483648, %v443_v21  ;;  %vm465_vm6 = vcmp.eq.f32.partialorder %v443_v21, 0.0 }
 0x688   :  { %v446_v22 = vmul.f32 %v762_v19, %v445_v20 }
 0x68a   :  { %v447_v23 = vmul.f32 0.5, %v446_v22 }
 0x68c   :  { %v448_v24 = vsub.f32 1.5, %v447_v23 }
 0x68d   :  { %v764_v25 = vpop.eup %763 }
 0x68e   :  { %v449_v26 = vmul.f32 %v762_v19, %v448_v24  ;;  %v457_v27 = vmul.f32 %v764_v25, %v443_v21 }
 0x690   :  { %v450_v28 = vmul.f32 %v449_v26, %v440_v18  ;;  %v458_v29 = vmul.f32 %v764_v25, %v457_v27 }
 0x692   :  { %v452_v31 = vsel %vm451_vm3, %v440_v18, %v450_v28  ;;  %v459_v32 = vmul.f32 0.5, %v458_v29 }
 0x693   :  { %v455_v33 = vsel %vm453_vm4, %v454_v30, %v452_v31 }
 0x694   :  { %v468_v34 = vmax.f32 %v455_v33, 1e-12  ;;  %v460_v35 = vsub.f32 1.5, %v459_v32 }
 0x696   :  { %765 = vrcp.f32 %v468_v34  ;;  %v461_v36 = vmul.f32 %v764_v25, %v460_v35  ;;  %vm475_vm9 = vweird.f32 %v468_v34  ;;  %v481_v53 = vand.u32 2147483648, %v468_v34 }
 0x697   :  { %v479_v55 = vand.u32 2147483647, %v468_v34 }
 0x698   :  { %v462_v37 = vmul.f32 %v461_v36, %v443_v21  ;;  %v482_v61 = vor.u32 1.1754944e-38, %v481_v53 }
 0x699   :  { %vm480_vm0 = vcmp.eq.f32.partialorder %v479_v55, 8.507059e+37 }
 0x69a   :  { %v464_v39 = vsel %vm463_vm5, %v443_v21, %v462_v37 }
 0x69b   :  { %v467_v40 = vsel %vm465_vm6, %v466_v38, %v464_v39 }
 0x69c   :  { %v766_v41 = vpop.eup %765  ;;  %v469_v42 = vmax.f32 %v467_v40, 1e-12 }
 0x69d   :  { %v471_v43 = vmul.f32 %v766_v41, %v468_v34  ;;  %vm476_vm7 = vweird.f32 %v766_v41 }
 0x69e   :  { %767 = vrcp.f32 %v469_v42  ;;  %v496_v49 = vand.u32 2147483648, %v469_v42  ;;  %v494_v51 = vand.u32 2147483647, %v469_v42  ;;  %vm490_vm10 = vweird.f32 %v469_v42  ;;  %vm477_vm11 = vmor %vm475_vm9, %vm476_vm7 }
 0x69f   :  { %v472_v44 = vsub.f32 1.0, %v471_v43 }
 0x6a0   :  { %v497_v56 = vor.u32 1.1754944e-38, %v496_v49  ;;  %vm495_vm13 = vcmp.eq.f32.partialorder %v494_v51, 8.507059e+37 }
 0x6a1   :  { %v473_v47 = vmul.f32 %v766_v41, %v472_v44  ;;  %v611_v44 = vld [vmem:[%s973_s5] sm:$0xff] }
 0x6a2   :  { %638 = vmatpush.msrb.mxu3 %v611_v44 }
 0x6a3   :  { %v474_v52 = vadd.f32 %v766_v41, %v473_v47  ;;  %v728_v47 = vld [vmem:[%s974_s6] ss:$0 sm:$0xff] }
 0x6a4   :  { %v768_v45 = vpop.eup %767 }
 0x6a5   :  { %v486_v46 = vmul.f32 %v768_v45, %v469_v42  ;;  %vm491_vm8 = vweird.f32 %v768_v45  ;;  %v478_v58 = vsel %vm477_vm11, %v766_v41, %v474_v52 }
 0x6a6   :  { %vm492_vm12 = vmor %vm490_vm10, %vm491_vm8  ;;  %v483_v63 = vsel %vm480_vm0, %v482_v61, %v478_v58  ;;  %vm646_vm8 = vcmask 31744  }
 0x6a7   :  { %v487_v48 = vsub.f32 1.0, %v486_v46  ;;  %v484_v0 = vmul.f32 %v483_v63, %v917_v12 }
 0x6a9   :  { %v488_v50 = vmul.f32 %v768_v45, %v487_v48 }
 0x6ab   :  { %v489_v54 = vadd.f32 %v768_v45, %v488_v50 }
 0x6ad   :  { %v493_v57 = vsel %vm492_vm12, %v768_v45, %v489_v54 }
 0x6ae   :  { %v498_v59 = vsel %vm495_vm13, %v497_v56, %v493_v57 }
 0x6af   :  { %v499_v62 = vmul.f32 %v498_v59, %v922_v15 }
 0x6b1   :  { %718 = vmatpush.xpose.msk.msrb.mxu2 %vm83_vm1, %v499_v62 }
 0x6b5   :  { %719 = vmatpush.xpose.msk.msrb.mxu2 %vm83_vm1, %v484_v0 }
 0x6b8   :  { %720 = vmatmul.msk.f32.vlgmr.msrb.gmra.mxu2 %vm83_vm1, %v484_v0 }
 0x6c0   :  { %721 = vmatmul.msk.f32.gmra.mxu2 %vm83_vm1, %v499_v62 }
 0x73b   :  { %v523_v3 = vpop.f32.mrf.mxu2 }
 0x73c   :  { %v530_v4 = vmul.f32 %v529_v1, %v523_v3 }
 0x73e   :  { %v532_v5 = vsel %vm178_vm14, %v530_v4, -1e+30 }
 0x73f   :  { %v534_v6 = vsel %vm83_vm1, %v532_v5, -inf }
 0x740   :  { %535 = vmax.xlane.f32.xlu2 %v534_v6 }
 0x743   :  { %v526_v7 = vpop.f32.mrf.mxu2 }
 0x744   :  { %v531_v8 = vmul.f32 %v529_v1, %v526_v7 }
 0x746   :  { %v533_v9 = vsel %vm179_vm15, %v531_v8, -1e+30 }
 0x747   :  { %v537_v10 = vsel %vm83_vm1, %v533_v9, -inf }
 0x748   :  { %538 = vmax.xlane.f32.xlu0 %v537_v10 }
 0x7b3   :  { %v536_v11 = vpop.xlane.xlu2 %535 }
 0x7b4   :  { %v540_v12 = vsub.f32 %v532_v5, %v536_v11 }
 0x7b6   :  { %v542_v13 = vmul.f32 1.442695, %v540_v12 }
 0x7b8   :  { %769 = vpow2.f32 %v542_v13 }
 0x7bb   :  { %v539_v14 = vpop.xlane.xlu0 %538 }
 0x7bc   :  { %v541_v15 = vsub.f32 %v533_v9, %v539_v14 }
 0x7be   :  { %v770_v16 = vpop.eup %769  ;;  %v544_v60 = vmul.f32 1.442695, %v541_v15 }
 0x7bf   :  { %v546_v17 = vsel %vm83_vm1, %v770_v16, 0.0 }
 0x7c0   :  { %771 = vpow2.f32 %v544_v60  ;;  %547 = vadd.xlane.f32.xlu1 %v546_v17 }
 0x7c6   :  { %v772_v18 = vpop.eup %771 }
 0x7c7   :  { %v549_v19 = vsel %vm83_vm1, %v772_v18, 0.0 }
 0x7c8   :  { %550 = vadd.xlane.f32.xlu2 %v549_v19 }
 0x833   :  { %v548_v20 = vpop.xlane.xlu1 %547 }
 0x834   :  { %773 = vrcp.f32 %v548_v20  ;;  %v563_v25 = vand.u32 2147483648, %v548_v20  ;;  %v561_v27 = vand.u32 2147483647, %v548_v20  ;;  %vm557_vm15 = vweird.f32 %v548_v20 }
 0x836   :  { %v564_v30 = vor.u32 1.1754944e-38, %v563_v25  ;;  %vm562_vm3 = vcmp.eq.f32.partialorder %v561_v27, 8.507059e+37 }
 0x83a   :  { %v774_v21 = vpop.eup %773 }
 0x83b   :  { %v553_v22 = vmul.f32 %v774_v21, %v548_v20  ;;  %v551_v23 = vpop.xlane.xlu2 %550  ;;  %vm558_vm14 = vweird.f32 %v774_v21 }
 0x83c   :  { %775 = vrcp.f32 %v551_v23  ;;  %vm559_vm2 = vmor %vm557_vm15, %vm558_vm14  ;;  %v578_v36 = vand.u32 2147483648, %v551_v23  ;;  %v576_v38 = vand.u32 2147483647, %v551_v23  ;;  %vm572_vm5 = vweird.f32 %v551_v23 }
 0x83d   :  { %v554_v24 = vsub.f32 1.0, %v553_v22 }
 0x83e   :  { %v579_v40 = vor.u32 1.1754944e-38, %v578_v36  ;;  %vm577_vm7 = vcmp.eq.f32.partialorder %v576_v38, 8.507059e+37 }
 0x83f   :  { %v555_v26 = vmul.f32 %v774_v21, %v554_v24 }
 0x841   :  { %v556_v28 = vadd.f32 %v774_v21, %v555_v26 }
 0x842   :  { %v776_v29 = vpop.eup %775 }
 0x843   :  { %v568_v31 = vmul.f32 %v776_v29, %v551_v23  ;;  %v560_v32 = vsel %vm559_vm2, %v774_v21, %v556_v28  ;;  %vm573_vm4 = vweird.f32 %v776_v29 }
 0x844   :  { %v565_v33 = vsel %vm562_vm3, %v564_v30, %v560_v32  ;;  %vm574_vm6 = vmor %vm572_vm5, %vm573_vm4 }
 0x845   :  { %v569_v34 = vsub.f32 1.0, %v568_v31  ;;  %v566_v35 = vmul.f32 %v770_v16, %v565_v33 }
 0x847   :  { %v570_v37 = vmul.f32 %v776_v29, %v569_v34  ;;  %722 = vmatmul.msk.f32.vlgmr.msrb.gmra.mxu1 %vm83_vm1, %v566_v35 }
 0x849   :  { %v571_v39 = vadd.f32 %v776_v29, %v570_v37 }
 0x84b   :  { %v575_v41 = vsel %vm574_vm6, %v776_v29, %v571_v39 }
 0x84c   :  { %v580_v42 = vsel %vm577_vm7, %v579_v40, %v575_v41 }
 0x84d   :  { %v581_v43 = vmul.f32 %v772_v18, %v580_v42 }
 0x84f   :  { %723 = vmatmul.msk.f32.gmra.mxu1 %vm83_vm1, %v581_v43 }
 0x8c4   :  { %v605_v45 = vpop.f32.mrf.mxu1 }
 0x8c5   :  { %724 = vmatmul.msk.f32.vlgmr.msrb.gmra.mxu3 %vm83_vm1, %v605_v45 }
 0x8cc   :  { %v608_v46 = vpop.f32.mrf.mxu1 }
 0x8cd   :  { %725 = vmatmul.msk.f32.gmra.mxu3 %vm83_vm1, %v608_v46 }
 0x948   :  { %v640_v48 = vpop.f32.mrf.mxu3 }
 0x949   :  { %v641_v49 = vadd.f32 %v728_v47, %v640_v48 }
 0x94b   :  { %v647_v50 = vsel %vm646_vm8, %v641_v49, -inf }
 0x94c   :  { %648 = vmax.xlane.f32.xlu0 %v647_v50 }
 0x950   :  { %v643_v51 = vpop.f32.mrf.mxu3 }
 0x951   :  { %v644_v52 = vadd.f32 %v728_v47, %v643_v51 }
 0x953   :  { %v650_v53 = vsel %vm646_vm8, %v644_v52, -inf }
 0x954   :  { %651 = vmax.xlane.f32.xlu1 %v650_v53 }
 0x9bf   :  { %v649_v54 = vpop.xlane.xlu0 %648 }
 0x9c0   :  { %v653_v55 = vsub.f32 %v641_v49, %v649_v54 }
 0x9c2   :  { %v655_v56 = vmul.f32 1.442695, %v653_v55 }
 0x9c4   :  { %777 = vpow2.f32 %v655_v56 }
 0x9c7   :  { %v652_v57 = vpop.xlane.xlu1 %651 }
 0x9c8   :  { %v654_v58 = vsub.f32 %v644_v52, %v652_v57 }
 0x9ca   :  { %v778_v59 = vpop.eup %777  ;;  %v657_v61 = vmul.f32 1.442695, %v654_v58 }
 0x9cb   :  { %v659_v62 = vsel %vm646_vm8, %v778_v59, 0.0 }
 0x9cc   :  { %779 = vpow2.f32 %v657_v61  ;;  %660 = vadd.xlane.f32.xlu2 %v659_v62 }
 0x9d2   :  { %v780_v63 = vpop.eup %779 }
 0x9d3   :  { %v662_v0 = vsel %vm646_vm8, %v780_v63, 0.0 }
 0x9d4   :  { %663 = vadd.xlane.f32.xlu0 %v662_v0 }
 0xa3f   :  { %v661_v1 = vpop.xlane.xlu2 %660 }
 0xa40   :  { %781 = vrcp.f32 %v661_v1  ;;  %v676_v7 = vand.u32 2147483648, %v661_v1  ;;  %v674_v9 = vand.u32 2147483647, %v661_v1  ;;  %vm670_vm9 = vweird.f32 %v661_v1 }
 0xa42   :  { %v677_v12 = vor.u32 1.1754944e-38, %v676_v7  ;;  %vm675_vm11 = vcmp.eq.f32.partialorder %v674_v9, 8.507059e+37 }
 0xa46   :  { %v782_v3 = vpop.eup %781 }
 0xa47   :  { %v666_v4 = vmul.f32 %v782_v3, %v661_v1  ;;  %v664_v5 = vpop.xlane.xlu0 %663  ;;  %vm671_vm1 = vweird.f32 %v782_v3 }
 0xa48   :  { %783 = vrcp.f32 %v664_v5  ;;  %vm672_vm10 = vmor %vm670_vm9, %vm671_vm1  ;;  %v691_v17 = vand.u32 2147483648, %v664_v5  ;;  %v689_v19 = vand.u32 2147483647, %v664_v5  ;;  %vm685_vm13 = vweird.f32 %v664_v5 }
 0xa49   :  { %v667_v6 = vsub.f32 1.0, %v666_v4 }
 0xa4a   :  { %v692_v20 = vor.u32 1.1754944e-38, %v691_v17  ;;  %vm690_vm14 = vcmp.eq.f32.partialorder %v689_v19, 8.507059e+37 }
 0xa4b   :  { %v668_v8 = vmul.f32 %v782_v3, %v667_v6 }
 0xa4d   :  { %v669_v10 = vadd.f32 %v782_v3, %v668_v8 }
 0xa4e   :  { %v784_v11 = vpop.eup %783 }
 0xa4f   :  { %v673_v13 = vsel %vm672_vm10, %v782_v3, %v669_v10  ;;  %v681_v14 = vmul.f32 %v784_v11, %v664_v5  ;;  %vm686_vm12 = vweird.f32 %v784_v11 }
 0xa50   :  { %v678_v15 = vsel %vm675_vm11, %v677_v12, %v673_v13  ;;  %vm687_vm0 = vmor %vm685_vm13, %vm686_vm12 }
 0xa51   :  { %v679_v16 = vmul.f32 %v778_v59, %v678_v15  ;;  %v682_v60 = vsub.f32 1.0, %v681_v14 }
 0xa53   :  { %695 = vst.msk [vmem:[%s975_s7] sm:$0xff] %vm646_vm8, %v679_v16  ;;  %v683_v18 = vmul.f32 %v784_v11, %v682_v60 }
 0xa55   :  { %v684_v2 = vadd.f32 %v784_v11, %v683_v18 }
 0xa57   :  { %v688_v21 = vsel %vm687_vm0, %v784_v11, %v684_v2 }
 0xa58   :  { %v693_v22 = vsel %vm690_vm14, %v692_v20, %v688_v21 }
 0xa59   :  { %v694_v23 = vmul.f32 %v780_v63, %v693_v22 }
 0xa5b   :  { %696 = vst.msk [vmem:[%s975_s7 + $0x8] sm:$0xff] %vm646_vm8, %v694_v23 }
 0xa5c   :  { %701 = vsyncpa [#allocation3], 1 }

</bundles_post_ra>
